<compile_context>
chip_gen: v7x
topology: tpu7x:2x2x1
jax: 0.10.0
libtpu: 0.0.40
codegen_flags: <defaults>
</compile_context>

<pallas_src>
import functools

import jax
import jax.numpy as jnp
from jax.experimental import pallas as pl
from jax.experimental.pallas import tpu as pltpu

IN_SIZE = 32        # in_size
OUT_SIZE = 16       # out_size
NUM_LAYERS = 2      # num_layers
ATT_SIZE = 10       # SelfAttention hidden size (second __init__ arg == 10)
K_PAD = 16          # zero-padded, lane-friendly key/query width
B, S = 2, 8         # batch, sequence length
MAX_GROUP_ROWS = 256  # cap on flattened rows per grid step (VMEM / MXU occupancy)


def sal_kernel(seq_len_ref,            # SMEM scalar-prefetch: (B,) int32
               x_ref,                  # (rows, D)   rows = group_b * S
               wqkv_ref, bqkv_ref,     # (L, D, 2*K_PAD+D), (L, 1, 2*K_PAD+D)
               wf_ref, bf_ref,         # (D, O),            (1, O)
               out_ref,                # (rows, O)
               *, num_layers, att_size, k_pad, group_b, seq):
    rows = group_b * seq
    g = pl.program_id(0)
    x = x_ref[...].astype(jnp.float32)                        # (rows, D)

    # Block-diagonal (same-batch) and key-validity masks over the flattened
    # (rows, rows) scores. Comparisons only; group_b is a small static constant.
    row = jax.lax.broadcasted_iota(jnp.int32, (rows, rows), 0)
    col = jax.lax.broadcasted_iota(jnp.int32, (rows, rows), 1)
    same_batch = jnp.zeros((rows, rows), dtype=jnp.bool_)
    key_valid = jnp.zeros((rows, rows), dtype=jnp.bool_)
    for bi in range(group_b):                                  # static unroll
        rin = (row >= bi * seq) & (row < (bi + 1) * seq)
        cin = (col >= bi * seq) & (col < (bi + 1) * seq)
        blk = rin & cin
        same_batch = same_batch | blk
        sl = seq_len_ref[g * group_b + bi]                     # SMEM scalar read
        key_valid = key_valid | (blk & (col < bi * seq + sl))

    scale = 1.0 / jnp.sqrt(jnp.float32(att_size))

    for l in range(num_layers):                                # static unroll
        # Fused (zero-padded) Q/K/V projection: one MXU push per layer.
        qkv = jnp.dot(x, wqkv_ref[l],
                      preferred_element_type=jnp.float32) + bqkv_ref[l]
        q = qkv[:, :k_pad]                                     # lane offset 0
        k = qkv[:, k_pad:2 * k_pad]                            # lane offset 16
        v = qkv[:, 2 * k_pad:]                                 # lane offset 32

        # q · kᵀ without materializing a transpose (shared last-axis contraction).
        scores = jax.lax.dot_general(
            q, k, (((1,), (1,)), ((), ())),
            preferred_element_type=jnp.float32) * scale
        scores = jnp.where(key_valid, scores, jnp.float32(-1e30))
        scores = scores - jnp.max(scores, axis=-1, keepdims=True)
        p = jnp.exp(scores)
        # Zero cross-batch entries AFTER exp: if seq_len[b]==0 the row
        # degenerates to uniform over that batch's own keys (matches the
        # per-batch reference) instead of leaking across the group.
        p = jnp.where(same_batch, p, 0.0)
        p = p * pl.reciprocal(jnp.sum(p, axis=-1, keepdims=True), approx=True)

        x = x + jnp.dot(p, v, preferred_element_type=jnp.float32)   # residual

    h = jnp.maximum(x, 0.0)                                    # ReLU
    y = jnp.tanh(jnp.dot(h, wf_ref[...], preferred_element_type=jnp.float32)
                 + bf_ref[...])                                # Linear + Tanh
    out_ref[...] = y.astype(out_ref.dtype)


def prepare_params(params):
    """One-time packing (do at param init/update, not per forward):
    pad Q/K to K_PAD zero lanes and fuse Q/K/V weights + biases."""
    L, D, K = params["wq"].shape
    pad = K_PAD - K
    zw = jnp.zeros((L, D, pad), jnp.float32)
    zb = jnp.zeros((L, 1, pad), jnp.float32)
    wqkv = jnp.concatenate([params["wq"], zw, params["wk"], zw, params["wv"]],
                           axis=-1)
    bqkv = jnp.concatenate([params["bq"], zb, params["bk"], zb, params["bv"]],
                           axis=-1)
    return dict(wqkv=wqkv, bqkv=bqkv, wf=params["wf"], bf=params["bf"])


def sal_forward(base, seq_len, packed):
    """base: (B, S, IN_SIZE) f32, seq_len: (B,) int32, packed: prepare_params()."""
    b, s, d = base.shape
    o = packed["wf"].shape[1]

    # Largest batch-group (divisor of b) whose flattened rows fit the cap.
    group_b = 1
    for cand in range(b, 0, -1):
        if b % cand == 0 and cand * s <= MAX_GROUP_ROWS:
            group_b = cand
            break
    rows = group_b * s
    n_groups = b // group_b

    x2d = base.reshape(b * s, d)

    const = lambda shape: pl.BlockSpec(shape, lambda g, sl: (0,) * len(shape))
    kernel = functools.partial(sal_kernel, num_layers=NUM_LAYERS,
                               att_size=ATT_SIZE, k_pad=K_PAD,
                               group_b=group_b, seq=s)

    # Advisory cost hint for XLA scheduling around the custom call.
    L = NUM_LAYERS
    flops = (2 * b * s * d * (2 * K_PAD + d) * L            # fused qkv matmuls
             + 2 * n_groups * rows * rows * (K_PAD + d) * L  # scores + p@v
             + 2 * b * s * d * o)                             # final linear
    transcendentals = n_groups * rows * rows * L + b * s * o  # exp + tanh
    bytes_accessed = 4 * (b * s * d + packed["wqkv"].size + packed["bqkv"].size
                          + packed["wf"].size + packed["bf"].size + b * s * o)

    out2d = pl.pallas_call(
        kernel,
        out_shape=jax.ShapeDtypeStruct((b * s, o), jnp.float32),
        grid_spec=pltpu.PrefetchScalarGridSpec(
            num_scalar_prefetch=1,
            grid=(n_groups,),                                 # batch-group axis
            in_specs=[
                pl.BlockSpec((rows, d), lambda g, sl: (g, 0)),   # activations
                const(packed["wqkv"].shape),                     # resident weights
                const(packed["bqkv"].shape),
                const(packed["wf"].shape),
                const(packed["bf"].shape),
            ],
            out_specs=pl.BlockSpec((rows, o), lambda g, sl: (g, 0)),
        ),
        compiler_params=pltpu.CompilerParams(
            dimension_semantics=("parallel",)),               # shard groups across TCs
        cost_estimate=pl.CostEstimate(flops=flops,
                                      transcendentals=transcendentals,
                                      bytes_accessed=bytes_accessed),
    )(seq_len, x2d, packed["wqkv"], packed["bqkv"], packed["wf"], packed["bf"])
    return out2d.reshape(b, s, o)


def sal_reference(base, seq_len, params):
    """Pure-JAX reference of the same semantics (for verification)."""
    x = base.astype(jnp.float32)
    b, s, _ = x.shape
    col = jnp.arange(s)[None, None, :]                       # (1,1,S)
    valid = col < seq_len[:, None, None]                     # (B,1,S)
    scale = 1.0 / jnp.sqrt(jnp.float32(ATT_SIZE))
    for l in range(NUM_LAYERS):
        q = x @ params["wq"][l] + params["bq"][l]
        k = x @ params["wk"][l] + params["bk"][l]
        v = x @ params["wv"][l] + params["bv"][l]
        sc = jnp.einsum("bqk,bjk->bqj", q, k) * scale
        sc = jnp.where(valid, sc, -1e30)
        p = jax.nn.softmax(sc, axis=-1)
        x = x + jnp.einsum("bqj,bjd->bqd", p, v)
    h = jnp.maximum(x, 0.0)
    return jnp.tanh(h @ params["wf"] + params["bf"])


def init_params(key):
    ks = jax.random.split(key, 8)
    sc = 0.1
    return dict(
        wq=sc * jax.random.normal(ks[0], (NUM_LAYERS, IN_SIZE, ATT_SIZE), jnp.float32),
        bq=sc * jax.random.normal(ks[1], (NUM_LAYERS, 1, ATT_SIZE), jnp.float32),
        wk=sc * jax.random.normal(ks[2], (NUM_LAYERS, IN_SIZE, ATT_SIZE), jnp.float32),
        bk=sc * jax.random.normal(ks[3], (NUM_LAYERS, 1, ATT_SIZE), jnp.float32),
        wv=sc * jax.random.normal(ks[4], (NUM_LAYERS, IN_SIZE, IN_SIZE), jnp.float32),
        bv=sc * jax.random.normal(ks[5], (NUM_LAYERS, 1, IN_SIZE), jnp.float32),
        wf=sc * jax.random.normal(ks[6], (IN_SIZE, OUT_SIZE), jnp.float32),
        bf=sc * jax.random.normal(ks[7], (1, OUT_SIZE), jnp.float32),
    )


if __name__ == "__main__":
    key = jax.random.PRNGKey(0)
    k_x, k_p = jax.random.split(key)
    base = jax.random.normal(k_x, (B, S, IN_SIZE), jnp.float32)
    seq_len = jnp.array([S, S - 3], dtype=jnp.int32)          # per-batch valid lengths
    params = init_params(k_p)
    packed = prepare_params(params)                           # one-time weight packing

    out = sal_forward(base, seq_len, packed)
    out = jax.block_until_ready(out)

    ref = sal_reference(base, seq_len, params)
    assert out.shape == (B, S, OUT_SIZE)
    # Loose tolerance accounts for approx-reciprocal softmax normalization.
    assert jnp.max(jnp.abs(out - ref)) < 5e-3, "mismatch vs reference"
    print("KERNEL_OK")
</pallas_src>

<mosaic_0001>
module attributes {stable_mosaic.version = 11 : i64} {
  func.func @sal_kernel(%arg0: i32, %arg1: memref<2xi32, #tpu.memory_space<smem>>, %arg2: memref<16x32xf32, #tpu.memory_space<vmem>>, %arg3: memref<2x32x64xf32, #tpu.memory_space<vmem>>, %arg4: memref<2x1x64xf32, #tpu.memory_space<vmem>>, %arg5: memref<32x16xf32, #tpu.memory_space<vmem>>, %arg6: memref<1x16xf32, #tpu.memory_space<vmem>>, %arg7: memref<16x16xf32, #tpu.memory_space<vmem>>) attributes {dimension_semantics = [#tpu.dimension_semantics<parallel>], iteration_bounds = array<i64: 1>, scalar_prefetch = 1 : i64, scratch_operands = 0 : i64, tpu.core_type = #tpu.core_type<tc>, window_params = [{transform_indices = @transform_0, window_bounds = array<i64: 16, 32>}, {pipeline_mode = #tpu.pipeline_mode<synchronous>, transform_indices = @transform_1, window_bounds = array<i64: 2, 32, 64>}, {pipeline_mode = #tpu.pipeline_mode<synchronous>, transform_indices = @transform_2, window_bounds = array<i64: 2, 1, 64>}, {pipeline_mode = #tpu.pipeline_mode<synchronous>, transform_indices = @transform_3, window_bounds = array<i64: 32, 16>}, {pipeline_mode = #tpu.pipeline_mode<synchronous>, transform_indices = @transform_4, window_bounds = array<i64: 1, 16>}, {transform_indices = @transform_5, window_bounds = array<i64: 16, 16>}]} {
    %c0 = arith.constant 0 : index
    %c0_0 = arith.constant 0 : index
    %0 = vector.load %arg2[%c0, %c0_0] : memref<16x32xf32, #tpu.memory_space<vmem>>, vector<16x32xf32>
    %1 = tpu.iota {dimensions = array<i32: 0>} : vector<16x16xi32>
    %2 = tpu.iota {dimensions = array<i32: 1>} : vector<16x16xi32>
    %false = arith.constant false
    %3 = vector.broadcast %false : i1 to vector<16x16xi1>
    %false_1 = arith.constant false
    %4 = vector.broadcast %false_1 : i1 to vector<16x16xi1>
    %c0_i32 = arith.constant 0 : i32
    %5 = vector.broadcast %c0_i32 : i32 to vector<16x16xi32>
    %6 = arith.cmpi sge, %1, %5 : vector<16x16xi32>
    %c8_i32 = arith.constant 8 : i32
    %7 = vector.broadcast %c8_i32 : i32 to vector<16x16xi32>
    %8 = arith.cmpi slt, %1, %7 : vector<16x16xi32>
    %9 = arith.andi %6, %8 : vector<16x16xi1>
    %c0_i32_2 = arith.constant 0 : i32
    %10 = vector.broadcast %c0_i32_2 : i32 to vector<16x16xi32>
    %11 = arith.cmpi sge, %2, %10 : vector<16x16xi32>
    %c8_i32_3 = arith.constant 8 : i32
    %12 = vector.broadcast %c8_i32_3 : i32 to vector<16x16xi32>
    %13 = arith.cmpi slt, %2, %12 : vector<16x16xi32>
    %14 = arith.andi %11, %13 : vector<16x16xi1>
    %15 = arith.andi %9, %14 : vector<16x16xi1>
    %16 = arith.ori %3, %15 : vector<16x16xi1>
    %c2_i32 = arith.constant 2 : i32
    %17 = arith.muli %arg0, %c2_i32 : i32
    %c0_i32_4 = arith.constant 0 : i32
    %18 = arith.addi %17, %c0_i32_4 : i32
    %19 = arith.index_cast %18 : i32 to index
    %20 = memref.load %arg1[%19] : memref<2xi32, #tpu.memory_space<smem>>
    %c0_i32_5 = arith.constant 0 : i32
    %21 = arith.addi %c0_i32_5, %20 : i32
    %22 = vector.broadcast %21 : i32 to vector<16x16xi32>
    %23 = arith.cmpi slt, %2, %22 : vector<16x16xi32>
    %24 = arith.andi %15, %23 : vector<16x16xi1>
    %25 = arith.ori %4, %24 : vector<16x16xi1>
    %c8_i32_6 = arith.constant 8 : i32
    %26 = vector.broadcast %c8_i32_6 : i32 to vector<16x16xi32>
    %27 = arith.cmpi sge, %1, %26 : vector<16x16xi32>
    %c16_i32 = arith.constant 16 : i32
    %28 = vector.broadcast %c16_i32 : i32 to vector<16x16xi32>
    %29 = arith.cmpi slt, %1, %28 : vector<16x16xi32>
    %30 = arith.andi %27, %29 : vector<16x16xi1>
    %c8_i32_7 = arith.constant 8 : i32
    %31 = vector.broadcast %c8_i32_7 : i32 to vector<16x16xi32>
    %32 = arith.cmpi sge, %2, %31 : vector<16x16xi32>
    %c16_i32_8 = arith.constant 16 : i32
    %33 = vector.broadcast %c16_i32_8 : i32 to vector<16x16xi32>
    %34 = arith.cmpi slt, %2, %33 : vector<16x16xi32>
    %35 = arith.andi %32, %34 : vector<16x16xi1>
    %36 = arith.andi %30, %35 : vector<16x16xi1>
    %37 = arith.ori %16, %36 : vector<16x16xi1>
    %c2_i32_9 = arith.constant 2 : i32
    %38 = arith.muli %arg0, %c2_i32_9 : i32
    %c1_i32 = arith.constant 1 : i32
    %39 = arith.addi %38, %c1_i32 : i32
    %40 = arith.index_cast %39 : i32 to index
    %41 = memref.load %arg1[%40] : memref<2xi32, #tpu.memory_space<smem>>
    %c8_i32_10 = arith.constant 8 : i32
    %42 = arith.addi %c8_i32_10, %41 : i32
    %43 = vector.broadcast %42 : i32 to vector<16x16xi32>
    %44 = arith.cmpi slt, %2, %43 : vector<16x16xi32>
    %45 = arith.andi %36, %44 : vector<16x16xi1>
    %46 = arith.ori %25, %45 : vector<16x16xi1>
    %cst = arith.constant 1.000000e+01 : f32
    %47 = math.sqrt %cst : f32
    %cst_11 = arith.constant 1.000000e+00 : f32
    %48 = arith.divf %cst_11, %47 : f32
    %c0_12 = arith.constant 0 : index
    %c0_13 = arith.constant 0 : index
    %c0_14 = arith.constant 0 : index
    %49 = vector.load %arg3[%c0_12, %c0_13, %c0_14] : memref<2x32x64xf32, #tpu.memory_space<vmem>>, vector<1x32x64xf32>
    %50 = vector.shape_cast %49 : vector<1x32x64xf32> to vector<32x64xf32>
    %cst_15 = arith.constant dense<0.000000e+00> : vector<16x64xf32>
    %51 = tpu.matmul %0, %50, %cst_15 {dimension_numbers = #tpu.dot_dimension_numbers<[1], [0], [0], [1], [0, 0, 1, 1], [], []>} : vector<16x32xf32>, vector<32x64xf32>, vector<16x64xf32> -> vector<16x64xf32>
    %c0_16 = arith.constant 0 : index
    %c0_17 = arith.constant 0 : index
    %c0_18 = arith.constant 0 : index
    %52 = vector.load %arg4[%c0_16, %c0_17, %c0_18] : memref<2x1x64xf32, #tpu.memory_space<vmem>>, vector<1x1x64xf32>
    %53 = vector.shape_cast %52 : vector<1x1x64xf32> to vector<1x64xf32>
    %54 = vector.broadcast %53 : vector<1x64xf32> to vector<16x64xf32>
    %55 = arith.addf %51, %54 : vector<16x64xf32>
    %56 = vector.extract_strided_slice %55 {offsets = [0, 0], sizes = [16, 16], strides = [1, 1]} : vector<16x64xf32> to vector<16x16xf32>
    %57 = vector.extract_strided_slice %55 {offsets = [0, 16], sizes = [16, 16], strides = [1, 1]} : vector<16x64xf32> to vector<16x16xf32>
    %58 = vector.extract_strided_slice %55 {offsets = [0, 32], sizes = [16, 32], strides = [1, 1]} : vector<16x64xf32> to vector<16x32xf32>
    %cst_19 = arith.constant dense<0.000000e+00> : vector<16x16xf32>
    %59 = tpu.matmul %56, %57, %cst_19 {dimension_numbers = #tpu.dot_dimension_numbers<[1], [1], [0], [0], [0, 0, 1, 0], [], []>} : vector<16x16xf32>, vector<16x16xf32>, vector<16x16xf32> -> vector<16x16xf32>
    %60 = vector.broadcast %48 : f32 to vector<16x16xf32>
    %61 = arith.mulf %59, %60 : vector<16x16xf32>
    %cst_20 = arith.constant -1.000000e+30 : f32
    %62 = vector.broadcast %cst_20 : f32 to vector<16x16xf32>
    %63 = arith.select %46, %61, %62 : vector<16x16xi1>, vector<16x16xf32>
    %cst_21 = arith.constant dense<0xFF800000> : vector<16xf32>
    %64 = vector.multi_reduction <maximumf>, %63, %cst_21 [1] : vector<16x16xf32> to vector<16xf32>
    %65 = vector.shape_cast %64 : vector<16xf32> to vector<16x1xf32>
    %66 = vector.broadcast %65 : vector<16x1xf32> to vector<16x16xf32>
    %67 = arith.subf %63, %66 : vector<16x16xf32>
    %68 = math.exp %67 : vector<16x16xf32>
    %cst_22 = arith.constant 0.000000e+00 : f32
    %69 = vector.broadcast %cst_22 : f32 to vector<16x16xf32>
    %70 = arith.select %37, %68, %69 : vector<16x16xi1>, vector<16x16xf32>
    %cst_23 = arith.constant dense<0.000000e+00> : vector<16xf32>
    %71 = vector.multi_reduction <add>, %70, %cst_23 [1] : vector<16x16xf32> to vector<16xf32>
    %72 = vector.shape_cast %71 : vector<16xf32> to vector<16x1xf32>
    %73 = tpu.reciprocal %72 {approx = true} : vector<16x1xf32> -> vector<16x1xf32>
    %74 = vector.broadcast %73 : vector<16x1xf32> to vector<16x16xf32>
    %75 = arith.mulf %70, %74 : vector<16x16xf32>
    %cst_24 = arith.constant dense<0.000000e+00> : vector<16x32xf32>
    %76 = tpu.matmul %75, %58, %cst_24 {dimension_numbers = #tpu.dot_dimension_numbers<[1], [0], [0], [1], [0, 0, 1, 1], [], []>} : vector<16x16xf32>, vector<16x32xf32>, vector<16x32xf32> -> vector<16x32xf32>
    %77 = arith.addf %0, %76 : vector<16x32xf32>
    %c1 = arith.constant 1 : index
    %c0_25 = arith.constant 0 : index
    %c0_26 = arith.constant 0 : index
    %78 = vector.load %arg3[%c1, %c0_25, %c0_26] : memref<2x32x64xf32, #tpu.memory_space<vmem>>, vector<1x32x64xf32>
    %79 = vector.shape_cast %78 : vector<1x32x64xf32> to vector<32x64xf32>
    %cst_27 = arith.constant dense<0.000000e+00> : vector<16x64xf32>
    %80 = tpu.matmul %77, %79, %cst_27 {dimension_numbers = #tpu.dot_dimension_numbers<[1], [0], [0], [1], [0, 0, 1, 1], [], []>} : vector<16x32xf32>, vector<32x64xf32>, vector<16x64xf32> -> vector<16x64xf32>
    %c1_28 = arith.constant 1 : index
    %c0_29 = arith.constant 0 : index
    %c0_30 = arith.constant 0 : index
    %81 = vector.load %arg4[%c1_28, %c0_29, %c0_30] : memref<2x1x64xf32, #tpu.memory_space<vmem>>, vector<1x1x64xf32>
    %82 = vector.shape_cast %81 : vector<1x1x64xf32> to vector<1x64xf32>
    %83 = vector.broadcast %82 : vector<1x64xf32> to vector<16x64xf32>
    %84 = arith.addf %80, %83 : vector<16x64xf32>
    %85 = vector.extract_strided_slice %84 {offsets = [0, 0], sizes = [16, 16], strides = [1, 1]} : vector<16x64xf32> to vector<16x16xf32>
    %86 = vector.extract_strided_slice %84 {offsets = [0, 16], sizes = [16, 16], strides = [1, 1]} : vector<16x64xf32> to vector<16x16xf32>
    %87 = vector.extract_strided_slice %84 {offsets = [0, 32], sizes = [16, 32], strides = [1, 1]} : vector<16x64xf32> to vector<16x32xf32>
    %cst_31 = arith.constant dense<0.000000e+00> : vector<16x16xf32>
    %88 = tpu.matmul %85, %86, %cst_31 {dimension_numbers = #tpu.dot_dimension_numbers<[1], [1], [0], [0], [0, 0, 1, 0], [], []>} : vector<16x16xf32>, vector<16x16xf32>, vector<16x16xf32> -> vector<16x16xf32>
    %89 = vector.broadcast %48 : f32 to vector<16x16xf32>
    %90 = arith.mulf %88, %89 : vector<16x16xf32>
    %cst_32 = arith.constant -1.000000e+30 : f32
    %91 = vector.broadcast %cst_32 : f32 to vector<16x16xf32>
    %92 = arith.select %46, %90, %91 : vector<16x16xi1>, vector<16x16xf32>
    %cst_33 = arith.constant dense<0xFF800000> : vector<16xf32>
    %93 = vector.multi_reduction <maximumf>, %92, %cst_33 [1] : vector<16x16xf32> to vector<16xf32>
    %94 = vector.shape_cast %93 : vector<16xf32> to vector<16x1xf32>
    %95 = vector.broadcast %94 : vector<16x1xf32> to vector<16x16xf32>
    %96 = arith.subf %92, %95 : vector<16x16xf32>
    %97 = math.exp %96 : vector<16x16xf32>
    %cst_34 = arith.constant 0.000000e+00 : f32
    %98 = vector.broadcast %cst_34 : f32 to vector<16x16xf32>
    %99 = arith.select %37, %97, %98 : vector<16x16xi1>, vector<16x16xf32>
    %cst_35 = arith.constant dense<0.000000e+00> : vector<16xf32>
    %100 = vector.multi_reduction <add>, %99, %cst_35 [1] : vector<16x16xf32> to vector<16xf32>
    %101 = vector.shape_cast %100 : vector<16xf32> to vector<16x1xf32>
    %102 = tpu.reciprocal %101 {approx = true} : vector<16x1xf32> -> vector<16x1xf32>
    %103 = vector.broadcast %102 : vector<16x1xf32> to vector<16x16xf32>
    %104 = arith.mulf %99, %103 : vector<16x16xf32>
    %cst_36 = arith.constant dense<0.000000e+00> : vector<16x32xf32>
    %105 = tpu.matmul %104, %87, %cst_36 {dimension_numbers = #tpu.dot_dimension_numbers<[1], [0], [0], [1], [0, 0, 1, 1], [], []>} : vector<16x16xf32>, vector<16x32xf32>, vector<16x32xf32> -> vector<16x32xf32>
    %106 = arith.addf %77, %105 : vector<16x32xf32>
    %cst_37 = arith.constant 0.000000e+00 : f32
    %107 = vector.broadcast %cst_37 : f32 to vector<16x32xf32>
    %108 = arith.maximumf %106, %107 : vector<16x32xf32>
    %c0_38 = arith.constant 0 : index
    %c0_39 = arith.constant 0 : index
    %109 = vector.load %arg5[%c0_38, %c0_39] : memref<32x16xf32, #tpu.memory_space<vmem>>, vector<32x16xf32>
    %cst_40 = arith.constant dense<0.000000e+00> : vector<16x16xf32>
    %110 = tpu.matmul %108, %109, %cst_40 {dimension_numbers = #tpu.dot_dimension_numbers<[1], [0], [0], [1], [0, 0, 1, 1], [], []>} : vector<16x32xf32>, vector<32x16xf32>, vector<16x16xf32> -> vector<16x16xf32>
    %c0_41 = arith.constant 0 : index
    %c0_42 = arith.constant 0 : index
    %111 = vector.load %arg6[%c0_41, %c0_42] : memref<1x16xf32, #tpu.memory_space<vmem>>, vector<1x16xf32>
    %112 = vector.broadcast %111 : vector<1x16xf32> to vector<16x16xf32>
    %113 = arith.addf %110, %112 : vector<16x16xf32>
    %114 = math.tanh %113 : vector<16x16xf32>
    %c0_43 = arith.constant 0 : index
    %c0_44 = arith.constant 0 : index
    %115 = vector.load %arg7[%c0_43, %c0_44] : memref<16x16xf32, #tpu.memory_space<vmem>>, vector<16x16xf32>
    tpu.vector_store %arg7[%c0_43, %c0_44], %114 {strides = array<i32>} : memref<16x16xf32, #tpu.memory_space<vmem>>, vector<16x16xf32>,
    return
  }
  func.func @transform_0(%arg0: i32, %arg1: memref<2xi32, #tpu.memory_space<smem>>) -> (i32, i32) {
    %c0_i32 = arith.constant 0 : i32
    %c0_i32_0 = arith.constant 0 : i32
    return %arg0, %c0_i32 : i32, i32
  }
  func.func @transform_1(%arg0: i32, %arg1: memref<2xi32, #tpu.memory_space<smem>>) -> (i32, i32, i32) {
    %c0_i32 = arith.constant 0 : i32
    %c0_i32_0 = arith.constant 0 : i32
    %c0_i32_1 = arith.constant 0 : i32
    %c0_i32_2 = arith.constant 0 : i32
    return %c0_i32, %c0_i32_0, %c0_i32_1 : i32, i32, i32
  }
  func.func @transform_2(%arg0: i32, %arg1: memref<2xi32, #tpu.memory_space<smem>>) -> (i32, i32, i32) {
    %c0_i32 = arith.constant 0 : i32
    %c0_i32_0 = arith.constant 0 : i32
    %c0_i32_1 = arith.constant 0 : i32
    %c0_i32_2 = arith.constant 0 : i32
    return %c0_i32, %c0_i32_0, %c0_i32_1 : i32, i32, i32
  }
  func.func @transform_3(%arg0: i32, %arg1: memref<2xi32, #tpu.memory_space<smem>>) -> (i32, i32) {
    %c0_i32 = arith.constant 0 : i32
    %c0_i32_0 = arith.constant 0 : i32
    %c0_i32_1 = arith.constant 0 : i32
    return %c0_i32, %c0_i32_0 : i32, i32
  }
  func.func @transform_4(%arg0: i32, %arg1: memref<2xi32, #tpu.memory_space<smem>>) -> (i32, i32) {
    %c0_i32 = arith.constant 0 : i32
    %c0_i32_0 = arith.constant 0 : i32
    %c0_i32_1 = arith.constant 0 : i32
    return %c0_i32, %c0_i32_0 : i32, i32
  }
  func.func @transform_5(%arg0: i32, %arg1: memref<2xi32, #tpu.memory_space<smem>>) -> (i32, i32) {
    %c0_i32 = arith.constant 0 : i32
    %c0_i32_0 = arith.constant 0 : i32
    return %arg0, %c0_i32 : i32, i32
  }
}

</mosaic_0001>

<bundles_post_ra>
// kernel: tpu_custom_call.1
= control target key start
LH: loop header
LB: loop body
LE: loop exit
PB: predicated region body
PF: predicated region fallthrough
CT: control target
= control target key end

     0   :  { %s1273_s0 = inlined_call_operand.vmem [shape: s32[2], index: 0, kind: input, shape index: {}]   ;;  %s1274_s1 = inlined_call_operand.vmem [shape: f32[16,32], index: 1, kind: input, shape index: {}]   ;;  %s1275_s2 = inlined_call_operand.hbm [shape: f32[2,32,64], index: 2, kind: input, shape index: {}]   ;;  %s1276_s3 = inlined_call_operand.vmem [shape: f32[2,1,64], index: 3, kind: input, shape index: {}]   ;;  %s1277_s4 = inlined_call_operand.vmem [shape: f32[32,16], index: 4, kind: input, shape index: {}]   ;;  %s1278_s5 = inlined_call_operand.vmem [shape: f32[1,16], index: 5, kind: input, shape index: {}]   ;;  %s1279_s6 = inlined_call_operand.hbm [shape: f32[16,16], index: 6, kind: output, shape index: {}]  }
   0x1   :  { %s11_s23 = sshll.u32 %s1273_s0, 4  ;;  %s12_s23 = int_to_ptr.vmem [resolvable:$true] %s11_s23 }
   0x2   :  { %s1012_s24 = scalar_lea.vmem %s12_s23, 16  ;;  %p1017_p1 = scmp.lt.s32.totalorder %s12_s23, %s12_s23 }
   0x3   :  { %p1013_p0 = scmp.ne.s32.totalorder %s12_s23, %s1012_s24  ;;  %p1018_p2 = scmp.lt.s32.totalorder %s1012_s24, %s1012_s24 }
   0x5   :  { %p1019_p3 = por %p1018_p2, %p1017_p1 }
   0x7   :  { %p1020_p4 = pnand %p1019_p3, %p1013_p0 }
   0x9   :  { %1023 = shalt.err (!%p1020_p4)  }
   0xa   :  { %s1074_s25 = smov [#allocation3]  }
   0xb   :  { %14 = dma.vmem_to_smem %s12_s23, 16, %s1074_s25, [#allocation2] }
   0xc   :  { %1068 = dma.done.wait [#allocation2], 16 }
   0xd   :  { %1069 = vsyncadd [#allocation2], 4294967280 }
   0xe   :  { %16 = sfence }
   0xf   :  { %17 = vsyncpa [#allocation5], 0 }
  0x10   :  { %18 = vsyncpa [#allocation6], 0  ;;  %s1075_s26 = smov [#allocation4]   ;;  %s1024_s29 = scalar_lea.hbm %s1275_s2, 1024 }
  0x11   :  { %s26_s27 = sshll.u32 %s1075_s26, 4  ;;  %p1025_p5 = scmp.ne.s32.totalorder %s1275_s2, %s1024_s29  ;;  %s27_s27 = int_to_ptr.vmem [resolvable:$true] %s26_s27 }
  0x12   :  { %p1028_p6 = scmp.lt.u32.totalorder %s1024_s29, %s1275_s2 }
  0x14   :  { %p1030_p7 = pnand %p1028_p6, %p1025_p5 }
  0x16   :  { %1033 = shalt.err (!%p1030_p7)
}
  0x17   :  { %s1034_s10 = scalar_lea.vmem %s27_s27, 1024  ;;  %p1039_p9 = scmp.lt.s32.totalorder %s27_s27, %s27_s27 }
  0x18   :  { %p1035_p8 = scmp.ne.s32.totalorder %s27_s27, %s1034_s10  ;;  %p1040_p10 = scmp.lt.s32.totalorder %s1034_s10, %s1034_s10 }
  0x1a   :  { %p1041_p11 = por %p1040_p10, %p1039_p9 }
  0x1c   :  { %p1042_p12 = pnand %p1041_p11, %p1035_p8 }
  0x1e   :  { %1045 = shalt.err (!%p1042_p12)
}
  0x1f   :  { %s1076_s11 = smov 128   ;;  %s1077_s12 = smov 8  }
  0x20   :  { %32 = dma.hbm_to_vmem [thread:$0]  %s1275_s2, 1024, %s27_s27, [#allocation5], %s1076_s11, %s1076_s11, %s1077_s12  }
  0x21   :  { %1070 = dma.done.wait [#allocation5], 1024  }
  0x22   :  { %1071 = vsyncadd [#allocation5], 4294966272  ;;  %vm99_vm0 = vcmask 261120   ;;  %v88_v0 = vld [vmem:[#allocation4] sm:$0xff]  ;;  %v89_v1 = vld [vmem:[#allocation4 + $0x8] sm:$0xff]  ;;  %vm187_vm1 = vcmask 130048   ;;  %v47_v19 = vlaneseq }
  0x23   :  { %v90_v2 = vld [vmem:[#allocation4 + $0x10] sm:$0xff]  ;;  %v921_v3 = vpack.c.bf16 %v89_v1, %v88_v0  ;;  %v91_v4 = vld [vmem:[#allocation4 + $0x18] sm:$0xff]  ;;  %v1137_v5 = vld [vmem:[%s1274_s1] sm:$0xff]  ;;  %s1078_s20 = smov 112   ;;  %s61_s21 = sld [smem:[#allocation3]] }
  0x24   :  { %v925_v6 = vpack.c.bf16 %v91_v4, %v90_v2  ;;  %868 = vmatprep.mubr.msk.f32.mxu0 %vm99_vm0, %v1137_v5  ;;  %v1144_v7 = vld [vmem:[%s1274_s1 + $0x8] sm:$0xff]  ;;  %v804_v8 = vld [vmem:[%s1276_s3] ss:$0 sm:$0xff]  ;;  %vm1155_vm2 = vmpackc.low %vm187_vm1, %vm187_vm1  ;;  %s803_s1 = sld [smem:[#allocation3 + $0x1]]  ;;  %v1164_v20 = vand.u32 127, %v47_v19  ;;  %s1079_s23 = smov 96  }
  0x25   :  { %922 = vmatprep.subr.bf16.mxu0 %v921_v3  ;;  %v389_v49 = vld [vmem:[#allocation4 + $0x20] sm:$0xff]  ;;  %v390_v50 = vld [vmem:[#allocation4 + $0x28] sm:$0xff]  ;;  %v391_v59 = vld [vmem:[#allocation4 + $0x30] sm:$0xff] }
  0x26   :  { %924 = vmatpush3.bf16.msra.mxu0 %v921_v3  ;;  %vm72_vm3 = vcmp.ge.s32.totalorder %v1164_v20, 8  ;;  %vm73_vm4 = vcmp.lt.s32.totalorder %v1164_v20, 16  ;;  %vm56_vm7 = vcmp.lt.s32.totalorder %v1164_v20, 8  ;;  %v939_v54 = vpack.c.bf16 %v390_v50, %v389_v49  ;;  %v392_v60 = vld [vmem:[#allocation4 + $0x38] sm:$0xff]  ;;  %v814_v2 = vld [vmem:[%s1276_s3 + $0x1] ss:$0 sm:$0xff] }
  0x27   :  { %926 = vmatprep.subr.bf16.mxu0 %v925_v6  ;;  %vm1168_vm5 = vmand %vm72_vm3, %vm73_vm4  ;;  %v943_v61 = vpack.c.bf16 %v392_v60, %v391_v59  ;;  %v691_v23 = vld [vmem:[%s1277_s4 + $0x8] sm:$0xff] }
  0x29   :  { %v62_v22 = vstv %s61_s21 }
  0x2a   :  { %928 = vmatpush3.bf16.msra.mxu0 %v925_v6  ;;  %s81_s22 = sadd.s32 8, %s803_s1  ;;  %vm63_vm8 = vcmp.lt.s32.totalorder %v1164_v20, %v62_v22 }
  0x2b   :  { %v82_v21 = vstv %s81_s22  ;;  %vm1183_vm10 = vmand %vm56_vm7, %vm63_vm8 }
  0x2c   :  { %vm83_vm6 = vcmp.lt.s32.totalorder %v1164_v20, %v82_v21 }
  0x2d   :  { %869 = vmatmul.mubr.msk.f32.vlgmr.msra.gmra.mrb[0].mxu0 %vm99_vm0, %v1144_v7  ;;  %vm1177_vm9 = vmand %vm1168_vm5, %vm83_vm6 }
 0x100   :  { %v870_v9 = vpop.f32.mrb[0].mxu0 }
 0x101   :  { %v178_v10 = vadd.f32 %v870_v9, %v804_v8  ;;  %v172_v11 = vpop.f32.mrb[1].mxu0 }
 0x102   :  { %v173_v12 = vadd.f32 %v804_v8, %v172_v11 }
 0x104   :  { %875 = vmatprep.mubr.msk.f32.mxu1 %vm187_vm1, %v173_v12  ;;  %v972_v13 = vpack.i.bf16 %v178_v10, %v173_v12 }
 0x106   :  { %973 = vrot.lane.b32.xlu0 %v972_v13, %s1078_s20 }
 0x178   :  { %v974_v14 = vpop.permute.xlu0 %973 }
 0x179   :  { %v976_v15 = vunpack.i.h.bf16 %v974_v14  ;;  %v975_v16 = vunpack.i.l.bf16 %v974_v14 }
 0x17b   :  { %v929_v18 = vpack.c.bf16 %v976_v15, %v975_v16 }
 0x17d   :  { %931 = vmatprep.subr.msk.bf16.mxu1 %vm1155_vm2, %v929_v18 }
 0x17e   :  { %934 = vmatpush3.bf16.xpose.msk.msra.mxu1 %vm1155_vm2, %v929_v18 }
 0x185   :  { %876 = vmatmul.mubr.msk.f32.vlgmr.msra.gmra.mrb[0].mxu1 %vm187_vm1, %v178_v10 }
 0x258   :  { %v877_v24 = vpop.f32.mrb[0].mxu1 }
 0x259   :  { %v272_v26 = vmul.f32 0.31622776, %v877_v24  ;;  %v262_v27 = vpop.f32.mrb[1].mxu1 }
 0x25a   :  { %v271_v29 = vmul.f32 0.31622776, %v262_v27 }
 0x25b   :  { %v274_v30 = vsel %vm1177_vm9, %v272_v26, -1e+30 }
 0x25c   :  { %v278_v31 = vsel %vm187_vm1, %v274_v30, -inf  ;;  %v273_v32 = vsel %vm1183_vm10, %v271_v29, -1e+30 }
 0x25d   :  { %279 = vmax.xlane.f32.xlu1 %v278_v31  ;;  %v275_v33 = vsel %vm187_vm1, %v273_v32, -inf }
 0x25e   :  { %276 = vmax.xlane.f32.xlu0 %v275_v33 }
 0x2ea   :  { %v280_v34 = vpop.xlane.xlu1 %279 }
 0x2eb   :  { %v282_v35 = vsub.f32 %v274_v30, %v280_v34  ;;  %v277_v36 = vpop.xlane.xlu0 %276  ;;  %v690_v34 = vld [vmem:[%s1277_s4] sm:$0xff] }
 0x2ec   :  { %v281_v37 = vsub.f32 %v273_v32, %v277_v36 }
 0x2ed   :  { %v285_v38 = vmul.f32 1.442695, %v282_v35  ;;  %v957_v35 = vpack.c.bf16 %v691_v23, %v690_v34 }
 0x2ee   :  { %v283_v39 = vmul.f32 1.442695, %v281_v37 }
 0x2ef   :  { %992 = vpow2.f32 %v285_v38 }
 0x2f0   :  { %994 = vpow2.f32 %v283_v39 }
 0x2f9   :  { %v993_v40 = vpop.eup %992 }
 0x2fa   :  { %v995_v41 = vpop.eup %994  ;;  %v288_v42 = vsel %vm1168_vm5, %v993_v40, 0.0 }
 0x2fb   :  { %v292_v43 = vsel %vm187_vm1, %v288_v42, 0.0  ;;  %v287_v44 = vsel %vm56_vm7, %v995_v41, 0.0 }
 0x2fc   :  { %293 = vadd.xlane.f32.xlu1 %v292_v43  ;;  %v289_v45 = vsel %vm187_vm1, %v287_v44, 0.0 }
 0x300   :  { %290 = vadd.xlane.f32.xlu1 %v289_v45  ;;  %v692_v45 = vld [vmem:[%s1277_s4 + $0x10] sm:$0xff] }
 0x311   :  { %978 = vrot.lane.b32.xlu1 %v972_v13, %s1079_s23 }
 0x389   :  { %v294_v46 = vpop.xlane.xlu1 %293 }
 0x38a   :  { %996 = vrcp.f32 %v294_v46  ;;  %v693_v46 = vld [vmem:[%s1277_s4 + $0x18] sm:$0xff]  ;;  %s1080_s4 = smov [#allocation7]  }
 0x38b   :  { %s791_s10 = sshll.u32 %s1080_s4, 4  ;;  %s792_s10 = int_to_ptr.vmem [resolvable:$true] %s791_s10 }
 0x38c   :  { %s1046_s13 = scalar_lea.vmem %s792_s10, 256  ;;  %p1051_p0 = scmp.lt.s32.totalorder %s792_s10, %s792_s10 }
 0x38d   :  { %v291_v47 = vpop.xlane.xlu1 %290  ;;  %p1047_p13 = scmp.ne.s32.totalorder %s792_s10, %s1046_s13  ;;  %p1052_p1 = scmp.lt.s32.totalorder %s1046_s13, %s1046_s13 }
 0x38e   :  { %998 = vrcp.f32 %v291_v47  ;;  %v961_v47 = vpack.c.bf16 %v693_v46, %v692_v45 }
 0x38f   :  { %p1053_p2 = por %p1052_p1, %p1051_p0 }
 0x391   :  { %v979_v48 = vpop.permute.xlu1 %978  ;;  %p1054_p3 = pnand %p1053_p2, %p1047_p13 }
 0x392   :  { %v981_v51 = vunpack.i.h.bf16 %v979_v48  ;;  %v980_v52 = vunpack.i.l.bf16 %v979_v48 }
 0x394   :  { %v935_v53 = vpack.c.bf16 %v981_v51, %v980_v52  ;;  %v997_v55 = vpop.eup %996 }
 0x395   :  { %v298_v58 = vmul.f32 %v997_v55, %v288_v42 }
 0x396   :  { %936 = vmatprep.subr.bf16.mxu1 %v935_v53 }
 0x397   :  { %938 = vmatpush3.bf16.msra.mxu1 %v935_v53 }
 0x398   :  { %v999_v56 = vpop.eup %998  ;;  %940 = vmatprep.subr.bf16.mxu1 %v939_v54 }
 0x399   :  { %v297_v57 = vmul.f32 %v999_v56, %v287_v44 }
 0x39b   :  { %882 = vmatprep.mubr.msk.f32.mxu1 %vm187_vm1, %v297_v57 }
 0x39c   :  { %883 = vmatmul.mubr.msk.f32.vlgmr.msra.gmra.mrb[2].mxu1 %vm187_vm1, %v298_v58 }
 0x39d   :  { %942 = vmatpush3.bf16.msra.mxu1 %v939_v54  ;;  %v823_v54 = vld [vmem:[%s1278_s5] ss:$0 sm:$0xff] }
 0x39e   :  { %944 = vmatprep.subr.bf16.mxu1 %v943_v61 }
 0x3a1   :  { %946 = vmatpush3.bf16.msra.mxu1 %v943_v61 }
 0x46f   :  { %v884_v62 = vpop.f32.mrb[2].mxu1 }
 0x470   :  { %v377_v63 = vpop.f32.mrb[3].mxu1  ;;  %v1206_v1 = vadd.f32 %v884_v62, %v1144_v7 }
 0x471   :  { %v1203_v0 = vadd.f32 %v377_v63, %v1137_v5 }
 0x473   :  { %893 = vmatprep.mubr.msk.f32.mxu1 %vm99_vm0, %v1203_v0 }
 0x474   :  { %894 = vmatmul.mubr.msk.f32.vlgmr.msra.gmra.mrb[4].mxu1 %vm99_vm0, %v1206_v1 }
 0x547   :  { %v895_v3 = vpop.f32.mrb[4].mxu1 }
 0x548   :  { %v479_v4 = vadd.f32 %v895_v3, %v814_v2  ;;  %v473_v6 = vpop.f32.mrb[5].mxu1 }
 0x549   :  { %v474_v8 = vadd.f32 %v814_v2, %v473_v6 }
 0x54b   :  { %900 = vmatprep.mubr.msk.f32.mxu0 %vm187_vm1, %v474_v8  ;;  %v982_v5 = vpack.i.bf16 %v479_v4, %v474_v8 }
 0x54d   :  { %983 = vrot.lane.b32.xlu1 %v982_v5, %s1078_s20 }
 0x5bf   :  { %v984_v7 = vpop.permute.xlu1 %983 }
 0x5c0   :  { %v986_v9 = vunpack.i.h.bf16 %v984_v7  ;;  %v985_v10 = vunpack.i.l.bf16 %v984_v7 }
 0x5c2   :  { %v947_v11 = vpack.c.bf16 %v986_v9, %v985_v10 }
 0x5c4   :  { %949 = vmatprep.subr.msk.bf16.mxu0 %vm1155_vm2, %v947_v11 }
 0x5c5   :  { %952 = vmatpush3.bf16.xpose.msk.msra.mxu0 %vm1155_vm2, %v947_v11 }
 0x5c6   :  { %958 = vmatprep.subr.bf16.mxu0 %v957_v35 }
 0x5cc   :  { %901 = vmatmul.mubr.msk.f32.vlgmr.msra.gmra.mrb[2].mxu0 %vm187_vm1, %v479_v4 }
 0x5cd   :  { %960 = vmatpush3.bf16.msra.mxu0 %v957_v35 }
 0x5ce   :  { %962 = vmatprep.subr.bf16.mxu0 %v961_v47 }
 0x5d1   :  { %964 = vmatpush3.bf16.msra.mxu0 %v961_v47 }
 0x69f   :  { %v902_v12 = vpop.f32.mrb[2].mxu0 }
 0x6a0   :  { %v572_v13 = vmul.f32 0.31622776, %v902_v12  ;;  %v562_v14 = vpop.f32.mrb[3].mxu0 }
 0x6a1   :  { %v571_v15 = vmul.f32 0.31622776, %v562_v14 }
 0x6a2   :  { %v574_v16 = vsel %vm1177_vm9, %v572_v13, -1e+30 }
 0x6a3   :  { %v578_v18 = vsel %vm187_vm1, %v574_v16, -inf  ;;  %v573_v19 = vsel %vm1183_vm10, %v571_v15, -1e+30 }
 0x6a4   :  { %579 = vmax.xlane.f32.xlu0 %v578_v18  ;;  %v575_v21 = vsel %vm187_vm1, %v573_v19, -inf }
 0x6a5   :  { %576 = vmax.xlane.f32.xlu1 %v575_v21 }
 0x731   :  { %v580_v17 = vpop.xlane.xlu0 %579 }
 0x732   :  { %v582_v22 = vsub.f32 %v574_v16, %v580_v17  ;;  %v577_v24 = vpop.xlane.xlu1 %576 }
 0x733   :  { %v581_v26 = vsub.f32 %v573_v19, %v577_v24 }
 0x734   :  { %v585_v27 = vmul.f32 1.442695, %v582_v22 }
 0x735   :  { %v583_v29 = vmul.f32 1.442695, %v581_v26 }
 0x736   :  { %1000 = vpow2.f32 %v585_v27 }
 0x737   :  { %1002 = vpow2.f32 %v583_v29 }
 0x740   :  { %v1001_v30 = vpop.eup %1000 }
 0x741   :  { %v1003_v25 = vpop.eup %1002  ;;  %v588_v31 = vsel %vm1168_vm5, %v1001_v30, 0.0 }
 0x742   :  { %v592_v28 = vsel %vm187_vm1, %v588_v31, 0.0  ;;  %v587_v32 = vsel %vm56_vm7, %v1003_v25, 0.0 }
 0x743   :  { %593 = vadd.xlane.f32.xlu0 %v592_v28  ;;  %v589_v33 = vsel %vm187_vm1, %v587_v32, 0.0 }
 0x747   :  { %590 = vadd.xlane.f32.xlu0 %v589_v33 }
 0x75d   :  { %988 = vrot.lane.b32.xlu0 %v982_v5, %s1079_s23 }
 0x7d0   :  { %v594_v36 = vpop.xlane.xlu0 %593 }
 0x7d1   :  { %1004 = vrcp.f32 %v594_v36 }
 0x7d4   :  { %v591_v20 = vpop.xlane.xlu0 %590 }
 0x7d5   :  { %1006 = vrcp.f32 %v591_v20 }
 0x7d8   :  { %v989_v37 = vpop.permute.xlu0 %988 }
 0x7d9   :  { %v991_v38 = vunpack.i.h.bf16 %v989_v37  ;;  %v990_v39 = vunpack.i.l.bf16 %v989_v37 }
 0x7db   :  { %v953_v40 = vpack.c.bf16 %v991_v38, %v990_v39  ;;  %v1005_v41 = vpop.eup %1004 }
 0x7dc   :  { %v598_v44 = vmul.f32 %v1005_v41, %v588_v31 }
 0x7dd   :  { %954 = vmatprep.subr.bf16.mxu1 %v953_v40 }
 0x7de   :  { %956 = vmatpush3.bf16.msra.mxu1 %v953_v40 }
 0x7df   :  { %v1007_v42 = vpop.eup %1006 }
 0x7e0   :  { %v597_v43 = vmul.f32 %v1007_v42, %v587_v32 }
 0x7e2   :  { %907 = vmatprep.mubr.msk.f32.mxu1 %vm187_vm1, %v597_v43 }
 0x7e3   :  { %908 = vmatmul.mubr.msk.f32.vlgmr.msra.gmra.mrb[6].mxu1 %vm187_vm1, %v598_v44 }
 0x8b6   :  { %v909_v48 = vpop.f32.mrb[6].mxu1 }
 0x8b7   :  { %v687_v49 = vadd.f32 %v909_v48, %v1206_v1  ;;  %v677_v50 = vpop.f32.mrb[7].mxu1 }
 0x8b8   :  { %v686_v51 = vadd.f32 %v677_v50, %v1203_v0 }
 0x8b9   :  { %v689_v53 = vmax.f32 %v687_v49, 0.0 }
 0x8ba   :  { %v688_v52 = vmax.f32 %v686_v51, 0.0 }
 0x8bc   :  { %918 = vmatprep.mubr.msk.f32.mxu0 %vm99_vm0, %v688_v52 }
 0x8bd   :  { %919 = vmatmul.mubr.msk.f32.vlgmr.msra.gmra.mrb[4].mxu0 %vm99_vm0, %v689_v53 }
 0x990   :  { %v920_v55 = vpop.f32.mrb[4].mxu0 }
 0x991   :  { %v779_v56 = vadd.f32 %v920_v55, %v823_v54  ;;  %v773_v57 = vpop.f32.mrb[5].mxu0 }
 0x992   :  { %v774_v58 = vadd.f32 %v823_v54, %v773_v57 }
 0x993   :  { %1008 = vtanh.f32 %v779_v56 }
 0x994   :  { %1010 = vtanh.f32 %v774_v58 }
 0x99d   :  { %v1009_v59 = vpop.eup %1008 }
 0x99e   :  { %v1011_v60 = vpop.eup %1010  ;;  %785 = vst.msk [vmem:[#allocation7 + $0x8] sm:$0xff] %vm187_vm1, %v1009_v59 }
 0x99f   :  { %784 = vst.msk [vmem:[#allocation7] sm:$0xff] %vm187_vm1, %v1011_v60 }
 0x9a0   :  { %1057 = shalt.err (!%p1054_p3)
}
 0x9a1   :  { %s1058_s15 = scalar_lea.hbm %s1279_s6, 256 }
 0x9a2   :  { %p1059_p4 = scmp.ne.s32.totalorder %s1279_s6, %s1058_s15  ;;  %p1062_p5 = scmp.lt.u32.totalorder %s1058_s15, %s1279_s6 }
 0x9a4   :  { %p1064_p6 = pnand %p1062_p5, %p1059_p4 }
 0x9a6   :  { %1067 = shalt.err (!%p1064_p6)
}
 0x9a7   :  { %797 = dma.vmem_to_hbm [thread:$0]  %s792_s10, 256, %s1279_s6, [#allocation6], %s1076_s11, %s1076_s11, %s1077_s12  }
 0x9a8   :  { %1072 = dma.done.wait [#allocation6], 256  }
 0x9a9   :  { %1073 = vsyncadd [#allocation6], 4294967040 }
 0x9aa   :  { %801 = vsyncpa [#allocation5], 1 }
 0x9ab   :  { %802 = vsyncpa [#allocation6], 1 }

</bundles_post_ra>
